<compile_context>
chip_gen: v7x
topology: tpu7x:2x2x1
jax: 0.10.0
libtpu: 0.0.40
codegen_flags: <defaults>
</compile_context>

<pallas_src>
import functools

import jax
import jax.numpy as jnp
from jax.experimental import pallas as pl
from jax.experimental.pallas import tpu as pltpu


# ----------------------------------------------------------------------------
# Pallas kernel: quantized attention for one batch element (all heads).
# ----------------------------------------------------------------------------
def _attn_int8_kernel(q_ref, k_ref, v_ref, mask_ref, o_ref, *,
                      q_quant, k_quant, qk_quant, v_quant, requant,
                      norm_factor):
    """q/k/v blocks: (1, H, S, D) f32; mask block: (1, 1, S); out: (1, S, H*D)."""
    q = q_ref[0]  # (H, S, D) float32
    k = k_ref[0]
    v = v_ref[0]
    H, S, D = q.shape

    # int8 / uint8 quantization (values are exact integers <= 255, so the bf16
    # MXU operands below are bit-exact while being much cheaper than f32).
    qq = jnp.clip(jnp.round(q * q_quant), -128.0, 127.0).astype(jnp.bfloat16)
    kq = jnp.clip(jnp.round(k * k_quant), -128.0, 127.0).astype(jnp.bfloat16)
    vq = jnp.clip(jnp.round(v * v_quant), -128.0, 127.0).astype(jnp.bfloat16)

    # scores = (q @ k^T) * 1/(sqrt(D) * q_quant * k_quant)
    # head-batched einsum contracting the last dim of BOTH operands: no K
    # transpose is materialized; f32 accumulation on the MXU.
    # TODO(synk): on v5e/v6e an int8 MXU path (preferred_element_type=int32)
    # would be ~2x faster still; kept bf16 so the kernel also lowers on v7x.
    scale = (1.0 / norm_factor) * (1.0 / q_quant) * (1.0 / k_quant)
    scores = jnp.einsum("hqd,hkd->hqk", qq, kq,
                        preferred_element_type=jnp.float32) * scale

    # causal mask (== self.bias tril in the torch module)
    row = jax.lax.broadcasted_iota(jnp.int32, (S, S), 0)
    col = jax.lax.broadcasted_iota(jnp.int32, (S, S), 1)
    causal = (col <= row)[None, :, :]                               # (1, S, S)
    scores = jnp.where(causal, scores, jnp.finfo(jnp.float32).min)

    # HF-style additive attention mask, broadcast over heads & query positions
    scores = scores + mask_ref[0]                                   # (1, S)

    # numerically-stable softmax; divide moved to the EUP reciprocal slot
    # (probabilities are re-quantized to 8 bits right after, precision is moot)
    m = jnp.max(scores, axis=-1, keepdims=True)
    e = jnp.exp(scores - m)
    inv = pl.reciprocal(jnp.sum(e, axis=-1, keepdims=True), approx=True)
    weights = e * inv

    # uint8 re-quantization of the attention probabilities (exact in bf16)
    wq = jnp.clip(jnp.round(weights * qk_quant), 0.0, 255.0).astype(jnp.bfloat16)

    # probs @ V, dequant, output re-quant
    out = jnp.einsum("hqk,hkd->hqd", wq, vq,
                     preferred_element_type=jnp.float32)            # (H, S, D)
    out = out * ((1.0 / qk_quant) * (1.0 / v_quant))
    out = jnp.clip(jnp.round(out * requant), -128.0, 127.0)

    # lane-dense store: merge heads into the last dim -> (S, H*D), one full
    # unmasked write (no 32-wide masked stores, no wrapper transpose needed).
    o_ref[0] = jnp.concatenate([out[h] for h in range(H)], axis=-1)


def _pallas_attn(query, key, value, attention_mask,
                 q_quant, k_quant, qk_quant, v_quant, requant, head_size):
    """query/key/value: (B, H, S, D) f32; attention_mask: (B, 1, 1, S) f32.

    Returns the attention output already head-merged: (B, S, H*D) f32.
    """
    B, H, S, D = query.shape
    norm_factor = float(head_size) ** 0.5
    mask = attention_mask.reshape(B, 1, S)

    kernel = functools.partial(
        _attn_int8_kernel,
        q_quant=float(q_quant), k_quant=float(k_quant),
        qk_quant=float(qk_quant), v_quant=float(v_quant),
        requant=float(requant), norm_factor=norm_factor)

    grid_spec = pltpu.PrefetchScalarGridSpec(
        num_scalar_prefetch=0,
        grid=(B,),
        in_specs=[
            pl.BlockSpec((1, H, S, D), lambda b: (b, 0, 0, 0)),   # q
            pl.BlockSpec((1, H, S, D), lambda b: (b, 0, 0, 0)),   # k
            pl.BlockSpec((1, H, S, D), lambda b: (b, 0, 0, 0)),   # v
            pl.BlockSpec((1, 1, S),    lambda b: (b, 0, 0)),      # additive mask
        ],
        out_specs=pl.BlockSpec((1, S, H * D), lambda b: (b, 0, 0)),
    )

    # TODO(synk): for prefill-scale S the monolithic (S,S) score tile must be
    # replaced by flash-style kv tiling (online softmax, causal tile skipping);
    # this full-sequence variant targets decode / short-context shapes.
    return pl.pallas_call(
        kernel,
        out_shape=jax.ShapeDtypeStruct((B, S, H * D), jnp.float32),
        grid_spec=grid_spec,
        compiler_params=pltpu.CompilerParams(
            dimension_semantics=("parallel",),
            vmem_limit_bytes=48 * 1024 * 1024),   # above default scoped, below v7x physical
    )(query, key, value, mask)


# ----------------------------------------------------------------------------
# JAX glue: qkv split + rotary embedding (matches torch semantics).
# ----------------------------------------------------------------------------
def _rotate_half(x):
    x1 = x[..., : x.shape[-1] // 2]
    x2 = x[..., x.shape[-1] // 2:]
    return jnp.concatenate([-x2, x1], axis=-1)


def gptneox_attention_int8(qkv, attention_mask, q_quant, k_quant, qk_quant,
                           v_quant, requant, *, num_heads, head_size,
                           rotary_ndims, rotary_base=10000.0):
    B, S, _ = qkv.shape
    qkv = qkv.reshape(B, S, num_heads, 3 * head_size)
    # TODO(synk): fuse the qkv split + rotary embedding (pltpu.roll for
    # rotate_half) into the kernel to remove these wrapper-side HBM passes.
    query = jnp.transpose(qkv[..., :head_size], (0, 2, 1, 3))                 # (B,H,S,D)
    key = jnp.transpose(qkv[..., head_size:2 * head_size], (0, 2, 1, 3))
    value = jnp.transpose(qkv[..., 2 * head_size:], (0, 2, 1, 3))

    # rotary embedding on the first rotary_ndims dims (offset=0, no layer_past)
    inv_freq = 1.0 / (rotary_base ** (jnp.arange(0, rotary_ndims, 2, dtype=jnp.float32)
                                      / rotary_ndims))
    t = jnp.arange(S, dtype=jnp.float32)
    freqs = jnp.einsum("i,j->ij", t, inv_freq)
    emb = jnp.concatenate([freqs, freqs], axis=-1)
    cos = jnp.cos(emb)[None, None, :, :]
    sin = jnp.sin(emb)[None, None, :, :]

    q_rot, q_pass = query[..., :rotary_ndims], query[..., rotary_ndims:]
    k_rot, k_pass = key[..., :rotary_ndims], key[..., rotary_ndims:]
    q_rot = q_rot * cos + _rotate_half(q_rot) * sin
    k_rot = k_rot * cos + _rotate_half(k_rot) * sin
    query = jnp.concatenate([q_rot, q_pass], axis=-1)
    key = jnp.concatenate([k_rot, k_pass], axis=-1)

    # kernel already returns the head-merged (B, S, hidden) layout
    attn_out = _pallas_attn(query, key, value, attention_mask,
                            q_quant, k_quant, qk_quant, v_quant, requant,
                            head_size)
    present = None  # use_cache=False
    return attn_out, present


# ----------------------------------------------------------------------------
# Pure-JAX reference mirroring the PyTorch module (for validation).
# ----------------------------------------------------------------------------
def _reference(qkv, attention_mask, q_quant, k_quant, qk_quant, v_quant, requant,
               *, num_heads, head_size, rotary_ndims, rotary_base=10000.0):
    B, S, _ = qkv.shape
    qkv = qkv.reshape(B, S, num_heads, 3 * head_size)
    query = jnp.transpose(qkv[..., :head_size], (0, 2, 1, 3))
    key = jnp.transpose(qkv[..., head_size:2 * head_size], (0, 2, 1, 3))
    value = jnp.transpose(qkv[..., 2 * head_size:], (0, 2, 1, 3))

    inv_freq = 1.0 / (rotary_base ** (jnp.arange(0, rotary_ndims, 2, dtype=jnp.float32)
                                      / rotary_ndims))
    t = jnp.arange(S, dtype=jnp.float32)
    freqs = jnp.einsum("i,j->ij", t, inv_freq)
    emb = jnp.concatenate([freqs, freqs], axis=-1)
    cos = jnp.cos(emb)[None, None, :, :]
    sin = jnp.sin(emb)[None, None, :, :]

    q_rot, q_pass = query[..., :rotary_ndims], query[..., rotary_ndims:]
    k_rot, k_pass = key[..., :rotary_ndims], key[..., rotary_ndims:]
    q_rot = q_rot * cos + _rotate_half(q_rot) * sin
    k_rot = k_rot * cos + _rotate_half(k_rot) * sin
    query = jnp.concatenate([q_rot, q_pass], axis=-1)
    key = jnp.concatenate([k_rot, k_pass], axis=-1)

    query = jnp.clip(jnp.round(query * q_quant), -128, 127)
    key = jnp.clip(jnp.round(key * k_quant), -128, 127)
    value = jnp.clip(jnp.round(value * v_quant), -128, 127)

    norm_factor = jnp.sqrt(jnp.float32(head_size))
    scale = (1.0 / norm_factor) * (1.0 / q_quant) * (1.0 / k_quant)
    scores = jnp.einsum("bhqd,bhkd->bhqk", query, key) * scale

    causal = jnp.tril(jnp.ones((S, S), dtype=bool))[None, None]
    scores = jnp.where(causal, scores, jnp.finfo(jnp.float32).min)
    scores = scores + attention_mask
    weights = jax.nn.softmax(scores, axis=-1)
    weights = jnp.clip(jnp.round(weights * qk_quant), 0, 255)
    out = jnp.einsum("bhqk,bhkd->bhqd", weights, value) * ((1.0 / qk_quant) * (1.0 / v_quant))
    out = jnp.clip(jnp.round(out * requant), -128, 127)
    out = jnp.transpose(out, (0, 2, 1, 3)).reshape(B, S, num_heads * head_size)
    return out


if __name__ == "__main__":
    # small config consistent with the module: hidden=128, heads=4, head_size=32,
    # rotary_pct=0.25 -> rotary_ndims=8, seq=8, batch=2
    B, S = 2, 8
    num_heads, head_size = 4, 32
    hidden = num_heads * head_size
    rotary_ndims = int(head_size * 0.25)

    key0 = jax.random.PRNGKey(0)
    k1, k2 = jax.random.split(key0)
    qkv = jax.random.normal(k1, (B, S, 3 * hidden), dtype=jnp.float32)

    # HF-style additive attention mask (B, 1, 1, S); mask out last key of batch 1
    attention_mask = jnp.zeros((B, 1, 1, S), dtype=jnp.float32)
    attention_mask = attention_mask.at[1, 0, 0, S - 1].set(-1e9)

    q_quant, k_quant, qk_quant, v_quant, requant = 8.0, 8.0, 127.0, 8.0, 0.5

    out, present = gptneox_attention_int8(
        qkv, attention_mask, q_quant, k_quant, qk_quant, v_quant, requant,
        num_heads=num_heads, head_size=head_size, rotary_ndims=rotary_ndims)
    out = jax.block_until_ready(out)

    ref = _reference(
        qkv, attention_mask, q_quant, k_quant, qk_quant, v_quant, requant,
        num_heads=num_heads, head_size=head_size, rotary_ndims=rotary_ndims)

    # output is quantized to integer-valued floats; allow at most one LSB of drift
    max_diff = float(jnp.max(jnp.abs(out - ref)))
    assert out.shape == (B, S, hidden), out.shape
    assert max_diff <= 1.0 + 1e-3, f"max diff too large: {max_diff}"
    print("KERNEL_OK")
</pallas_src>

<mosaic_0001>
module attributes {stable_mosaic.version = 11 : i64} {
  func.func @_attn_int8_kernel(%arg0: i32, %arg1: memref<1x4x8x32xf32, #tpu.memory_space<vmem>>, %arg2: memref<1x4x8x32xf32, #tpu.memory_space<vmem>>, %arg3: memref<1x4x8x32xf32, #tpu.memory_space<vmem>>, %arg4: memref<1x1x8xf32, #tpu.memory_space<vmem>>, %arg5: memref<1x8x128xf32, #tpu.memory_space<vmem>>) attributes {dimension_semantics = [#tpu.dimension_semantics<parallel>], iteration_bounds = array<i64: 2>, scalar_prefetch = 0 : i64, scratch_operands = 0 : i64, tpu.core_type = #tpu.core_type<tc>, window_params = [{transform_indices = @transform_0, window_bounds = array<i64: 1, 4, 8, 32>}, {transform_indices = @transform_1, window_bounds = array<i64: 1, 4, 8, 32>}, {transform_indices = @transform_2, window_bounds = array<i64: 1, 4, 8, 32>}, {transform_indices = @transform_3, window_bounds = array<i64: 1, 1, 8>}, {transform_indices = @transform_4, window_bounds = array<i64: 1, 8, 128>}]} {
    %c0 = arith.constant 0 : index
    %c0_0 = arith.constant 0 : index
    %c0_1 = arith.constant 0 : index
    %c0_2 = arith.constant 0 : index
    %0 = vector.load %arg1[%c0, %c0_0, %c0_1, %c0_2] : memref<1x4x8x32xf32, #tpu.memory_space<vmem>>, vector<1x4x8x32xf32>
    %1 = vector.shape_cast %0 : vector<1x4x8x32xf32> to vector<4x8x32xf32>
    %c0_3 = arith.constant 0 : index
    %c0_4 = arith.constant 0 : index
    %c0_5 = arith.constant 0 : index
    %c0_6 = arith.constant 0 : index
    %2 = vector.load %arg2[%c0_3, %c0_4, %c0_5, %c0_6] : memref<1x4x8x32xf32, #tpu.memory_space<vmem>>, vector<1x4x8x32xf32>
    %3 = vector.shape_cast %2 : vector<1x4x8x32xf32> to vector<4x8x32xf32>
    %c0_7 = arith.constant 0 : index
    %c0_8 = arith.constant 0 : index
    %c0_9 = arith.constant 0 : index
    %c0_10 = arith.constant 0 : index
    %4 = vector.load %arg3[%c0_7, %c0_8, %c0_9, %c0_10] : memref<1x4x8x32xf32, #tpu.memory_space<vmem>>, vector<1x4x8x32xf32>
    %5 = vector.shape_cast %4 : vector<1x4x8x32xf32> to vector<4x8x32xf32>
    %cst = arith.constant 8.000000e+00 : f32
    %6 = vector.broadcast %cst : f32 to vector<4x8x32xf32>
    %7 = arith.mulf %1, %6 : vector<4x8x32xf32>
    %8 = math.roundeven %7 : vector<4x8x32xf32>
    %cst_11 = arith.constant -1.280000e+02 : f32
    %cst_12 = arith.constant 1.270000e+02 : f32
    %9 = vector.broadcast %cst_11 : f32 to vector<4x8x32xf32>
    %10 = arith.maximumf %9, %8 : vector<4x8x32xf32>
    %11 = vector.broadcast %cst_12 : f32 to vector<4x8x32xf32>
    %12 = arith.minimumf %11, %10 : vector<4x8x32xf32>
    %13 = arith.truncf %12 : vector<4x8x32xf32> to vector<4x8x32xbf16>
    %cst_13 = arith.constant 8.000000e+00 : f32
    %14 = vector.broadcast %cst_13 : f32 to vector<4x8x32xf32>
    %15 = arith.mulf %3, %14 : vector<4x8x32xf32>
    %16 = math.roundeven %15 : vector<4x8x32xf32>
    %cst_14 = arith.constant -1.280000e+02 : f32
    %cst_15 = arith.constant 1.270000e+02 : f32
    %17 = vector.broadcast %cst_14 : f32 to vector<4x8x32xf32>
    %18 = arith.maximumf %17, %16 : vector<4x8x32xf32>
    %19 = vector.broadcast %cst_15 : f32 to vector<4x8x32xf32>
    %20 = arith.minimumf %19, %18 : vector<4x8x32xf32>
    %21 = arith.truncf %20 : vector<4x8x32xf32> to vector<4x8x32xbf16>
    %cst_16 = arith.constant 8.000000e+00 : f32
    %22 = vector.broadcast %cst_16 : f32 to vector<4x8x32xf32>
    %23 = arith.mulf %5, %22 : vector<4x8x32xf32>
    %24 = math.roundeven %23 : vector<4x8x32xf32>
    %cst_17 = arith.constant -1.280000e+02 : f32
    %cst_18 = arith.constant 1.270000e+02 : f32
    %25 = vector.broadcast %cst_17 : f32 to vector<4x8x32xf32>
    %26 = arith.maximumf %25, %24 : vector<4x8x32xf32>
    %27 = vector.broadcast %cst_18 : f32 to vector<4x8x32xf32>
    %28 = arith.minimumf %27, %26 : vector<4x8x32xf32>
    %29 = arith.truncf %28 : vector<4x8x32xf32> to vector<4x8x32xbf16>
    "tpu.trace_start"() <{level = 10 : i32, message = "hqd,hkd->hqk"}> : () -> ()
    %cst_19 = arith.constant dense<0.000000e+00> : vector<4x8x8xf32>
    %30 = tpu.matmul %13, %21, %cst_19 {dimension_numbers = #tpu.dot_dimension_numbers<[2], [2], [1], [1], [0, 0, 0, 1, 1, 1], [0], [0]>} : vector<4x8x32xbf16>, vector<4x8x32xbf16>, vector<4x8x8xf32> -> vector<4x8x8xf32>
    "tpu.trace_stop"() : () -> ()
    %cst_20 = arith.constant 0.00276213582 : f32
    %31 = vector.broadcast %cst_20 : f32 to vector<4x8x8xf32>
    %32 = arith.mulf %30, %31 : vector<4x8x8xf32>
    %33 = tpu.iota {dimensions = array<i32: 0>} : vector<8x8xi32>
    %34 = tpu.iota {dimensions = array<i32: 1>} : vector<8x8xi32>
    %35 = arith.cmpi sle, %34, %33 : vector<8x8xi32>
    %36 = vector.shape_cast %35 : vector<8x8xi1> to vector<1x8x8xi1>
    %cst_21 = arith.constant -3.40282347E+38 : f32
    %37 = vector.shape_cast %36 : vector<1x8x8xi1> to vector<1x8x8xi1>
    %38 = vector.broadcast %37 : vector<1x8x8xi1> to vector<4x8x8xi1>
    %39 = vector.broadcast %cst_21 : f32 to vector<4x8x8xf32>
    %40 = arith.select %38, %32, %39 : vector<4x8x8xi1>, vector<4x8x8xf32>
    %c0_22 = arith.constant 0 : index
    %c0_23 = arith.constant 0 : index
    %c0_24 = arith.constant 0 : index
    %41 = vector.load %arg4[%c0_22, %c0_23, %c0_24] : memref<1x1x8xf32, #tpu.memory_space<vmem>>, vector<1x1x8xf32>
    %42 = vector.shape_cast %41 : vector<1x1x8xf32> to vector<1x8xf32>
    %43 = vector.shape_cast %42 : vector<1x8xf32> to vector<1x1x8xf32>
    %44 = vector.broadcast %43 : vector<1x1x8xf32> to vector<4x8x8xf32>
    %45 = arith.addf %40, %44 : vector<4x8x8xf32>
    %cst_25 = arith.constant dense<0xFF800000> : vector<4x8xf32>
    %46 = vector.multi_reduction <maximumf>, %45, %cst_25 [2] : vector<4x8x8xf32> to vector<4x8xf32>
    %47 = vector.shape_cast %46 : vector<4x8xf32> to vector<4x8x1xf32>
    %48 = vector.broadcast %47 : vector<4x8x1xf32> to vector<4x8x8xf32>
    %49 = arith.subf %45, %48 : vector<4x8x8xf32>
    %50 = math.exp %49 : vector<4x8x8xf32>
    %cst_26 = arith.constant dense<0.000000e+00> : vector<4x8xf32>
    %51 = vector.multi_reduction <add>, %50, %cst_26 [2] : vector<4x8x8xf32> to vector<4x8xf32>
    %52 = vector.shape_cast %51 : vector<4x8xf32> to vector<4x8x1xf32>
    %53 = tpu.reciprocal %52 {approx = true} : vector<4x8x1xf32> -> vector<4x8x1xf32>
    %54 = vector.broadcast %53 : vector<4x8x1xf32> to vector<4x8x8xf32>
    %55 = arith.mulf %50, %54 : vector<4x8x8xf32>
    %cst_27 = arith.constant 1.270000e+02 : f32
    %56 = vector.broadcast %cst_27 : f32 to vector<4x8x8xf32>
    %57 = arith.mulf %55, %56 : vector<4x8x8xf32>
    %58 = math.roundeven %57 : vector<4x8x8xf32>
    %cst_28 = arith.constant 0.000000e+00 : f32
    %cst_29 = arith.constant 2.550000e+02 : f32
    %59 = vector.broadcast %cst_28 : f32 to vector<4x8x8xf32>
    %60 = arith.maximumf %59, %58 : vector<4x8x8xf32>
    %61 = vector.broadcast %cst_29 : f32 to vector<4x8x8xf32>
    %62 = arith.minimumf %61, %60 : vector<4x8x8xf32>
    %63 = arith.truncf %62 : vector<4x8x8xf32> to vector<4x8x8xbf16>
    "tpu.trace_start"() <{level = 10 : i32, message = "hqk,hkd->hqd"}> : () -> ()
    %cst_30 = arith.constant dense<0.000000e+00> : vector<4x8x32xf32>
    %64 = tpu.matmul %63, %29, %cst_30 {dimension_numbers = #tpu.dot_dimension_numbers<[2], [1], [1], [2], [0, 0, 0, 1, 1, 2], [0], [0]>} : vector<4x8x8xbf16>, vector<4x8x32xbf16>, vector<4x8x32xf32> -> vector<4x8x32xf32>
    "tpu.trace_stop"() : () -> ()
    %cst_31 = arith.constant 9.842520e-04 : f32
    %65 = vector.broadcast %cst_31 : f32 to vector<4x8x32xf32>
    %66 = arith.mulf %64, %65 : vector<4x8x32xf32>
    %cst_32 = arith.constant 5.000000e-01 : f32
    %67 = vector.broadcast %cst_32 : f32 to vector<4x8x32xf32>
    %68 = arith.mulf %66, %67 : vector<4x8x32xf32>
    %69 = math.roundeven %68 : vector<4x8x32xf32>
    %cst_33 = arith.constant -1.280000e+02 : f32
    %cst_34 = arith.constant 1.270000e+02 : f32
    %70 = vector.broadcast %cst_33 : f32 to vector<4x8x32xf32>
    %71 = arith.maximumf %70, %69 : vector<4x8x32xf32>
    %72 = vector.broadcast %cst_34 : f32 to vector<4x8x32xf32>
    %73 = arith.minimumf %72, %71 : vector<4x8x32xf32>
    %74 = vector.extract_strided_slice %73 {offsets = [0, 0, 0], sizes = [1, 8, 32], strides = [1, 1, 1]} : vector<4x8x32xf32> to vector<1x8x32xf32>
    %75 = vector.shape_cast %74 : vector<1x8x32xf32> to vector<8x32xf32>
    %76 = vector.extract_strided_slice %73 {offsets = [1, 0, 0], sizes = [1, 8, 32], strides = [1, 1, 1]} : vector<4x8x32xf32> to vector<1x8x32xf32>
    %77 = vector.shape_cast %76 : vector<1x8x32xf32> to vector<8x32xf32>
    %78 = vector.extract_strided_slice %73 {offsets = [2, 0, 0], sizes = [1, 8, 32], strides = [1, 1, 1]} : vector<4x8x32xf32> to vector<1x8x32xf32>
    %79 = vector.shape_cast %78 : vector<1x8x32xf32> to vector<8x32xf32>
    %80 = vector.extract_strided_slice %73 {offsets = [3, 0, 0], sizes = [1, 8, 32], strides = [1, 1, 1]} : vector<4x8x32xf32> to vector<1x8x32xf32>
    %81 = vector.shape_cast %80 : vector<1x8x32xf32> to vector<8x32xf32>
    %82 = tpu.concatenate %75, %77, %79, %81 in 1 : vector<8x32xf32>, vector<8x32xf32>, vector<8x32xf32>, vector<8x32xf32> -> vector<8x128xf32>
    %c0_35 = arith.constant 0 : index
    %c0_36 = arith.constant 0 : index
    %c0_37 = arith.constant 0 : index
    %83 = vector.load %arg5[%c0_35, %c0_36, %c0_37] : memref<1x8x128xf32, #tpu.memory_space<vmem>>, vector<1x8x128xf32>
    %84 = vector.shape_cast %83 : vector<1x8x128xf32> to vector<8x128xf32>
    %85 = vector.shape_cast %82 : vector<8x128xf32> to vector<1x8x128xf32>
    tpu.vector_store %arg5[%c0_35, %c0_36, %c0_37], %85 {strides = array<i32>} : memref<1x8x128xf32, #tpu.memory_space<vmem>>, vector<1x8x128xf32>,
    return
  }
  func.func @transform_0(%arg0: i32) -> (i32, i32, i32, i32) {
    %c0_i32 = arith.constant 0 : i32
    %c0_i32_0 = arith.constant 0 : i32
    %c0_i32_1 = arith.constant 0 : i32
    %c0_i32_2 = arith.constant 0 : i32
    return %arg0, %c0_i32, %c0_i32_0, %c0_i32_1 : i32, i32, i32, i32
  }
  func.func @transform_1(%arg0: i32) -> (i32, i32, i32, i32) {
    %c0_i32 = arith.constant 0 : i32
    %c0_i32_0 = arith.constant 0 : i32
    %c0_i32_1 = arith.constant 0 : i32
    %c0_i32_2 = arith.constant 0 : i32
    return %arg0, %c0_i32, %c0_i32_0, %c0_i32_1 : i32, i32, i32, i32
  }
  func.func @transform_2(%arg0: i32) -> (i32, i32, i32, i32) {
    %c0_i32 = arith.constant 0 : i32
    %c0_i32_0 = arith.constant 0 : i32
    %c0_i32_1 = arith.constant 0 : i32
    %c0_i32_2 = arith.constant 0 : i32
    return %arg0, %c0_i32, %c0_i32_0, %c0_i32_1 : i32, i32, i32, i32
  }
  func.func @transform_3(%arg0: i32) -> (i32, i32, i32) {
    %c0_i32 = arith.constant 0 : i32
    %c0_i32_0 = arith.constant 0 : i32
    %c0_i32_1 = arith.constant 0 : i32
    return %arg0, %c0_i32, %c0_i32_0 : i32, i32, i32
  }
  func.func @transform_4(%arg0: i32) -> (i32, i32, i32) {
    %c0_i32 = arith.constant 0 : i32
    %c0_i32_0 = arith.constant 0 : i32
    %c0_i32_1 = arith.constant 0 : i32
    return %arg0, %c0_i32, %c0_i32_0 : i32, i32, i32
  }
}

</mosaic_0001>

<bundles_post_ra>
// kernel: tpu_custom_call.1
= control target key start
LH: loop header
LB: loop body
LE: loop exit
PB: predicated region body
PF: predicated region fallthrough
CT: control target
= control target key end

     0   :  { %s1726_s0 = inlined_call_operand.hbm [shape: f32[2,4,8,32], index: 0, kind: input, shape index: {}]   ;;  %s1727_s1 = inlined_call_operand.hbm [shape: f32[2,4,8,32], index: 1, kind: input, shape index: {}]   ;;  %s1728_s2 = inlined_call_operand.hbm [shape: f32[2,4,8,32], index: 2, kind: input, shape index: {}]   ;;  %s1729_s3 = inlined_call_operand.vmem [shape: f32[2,1,8], index: 3, kind: input, shape index: {}]   ;;  %s1730_s4 = inlined_call_operand.hbm [shape: f32[2,8,128], index: 4, kind: output, shape index: {}]  }
   0x1   :  { %1737 = sst [smem:[#allocation12_spill]] %s1726_s0 }
   0x2   :  { %1738 = sst [smem:[#allocation13_spill]] %s1727_s1 }
   0x3   :  { %9 = vsyncpa [#allocation3], 0 }
   0x4   :  { %11 = vsyncpa [#allocation3 + $0x1], 0 }
   0x5   :  { %12 = vsyncpa [#allocation6], 0 }
   0x6   :  { %14 = vsyncpa [#allocation6 + $0x1], 0 }
   0x7   :  { %15 = vsyncpa [#allocation4], 0 }
   0x8   :  { %17 = vsyncpa [#allocation4 + $0x1], 0  ;;  %s1409_s15 = smov 0   ;;  %s1411_s16 = smov 0  }
   0x9   :  { %s1413_s17 = smov 0   ;;  %s1415_s18 = smov 0  }
   0xa LB: > { %s1430_s19 = sadd.s32 4294967295, %s1371_s18   ;;  %s1015_s20 = sadd.s32 4294967294, %s1371_s18   ;;  %s1371_s18 = sphi %s1415_s18, %s1758_s18   ;;  %s1367_s17 = sphi %s1413_s17, %s1757_s17   ;;  %s1363_s16 = sphi %s1411_s16, %s1756_s16   ;;  %s1359_s15 = sphi %s1409_s15, %s1755_s15  }
   0xb   : > { %s1434_s21 = sadd.s32 1, %s1371_s18   ;;  %s30_s22 = sadd.s32 1, %s1367_s17 }
   0xc   : > { %s27_s23 = ssub.s32 %s1371_s18, %s1434_s21  ;;  %p37_p0 = scmp.ne.s32.totalorder %s1367_s17, %s1363_s16 }
   0xd   : > { %p28_p1 = scmp.eq.s32.totalorder %s27_s23, 0  ;;  %p38_p2 = scmp.eq.s32.totalorder %s1371_s18, 0 }
   0xe   : > { %p43_p3 = scmp.ne.s32.totalorder %s1363_s16, %s1359_s15  ;;  %p44_p4 = scmp.eq.s32.totalorder %s1430_s19, 0 }
   0xf   : > { %s1446_s24 = scalar_select %p28_p1, %s1367_s17, %s30_s22  }
  0x10   : > { %p39_p5 = por %p38_p2, %p37_p0  ;;  %p1448_p6 = por %p44_p4, %p43_p3 }
  0x11   : > { %p145_p7 = scmp.eq.s32.totalorder %s1430_s19, 1  ;;  %p151_p8 = scmp.eq.s32.totalorder %s1015_s20, 1 }
  0x12   : > { %s1739_s25 = scalar_select %p1448_p6, 1, 0 }
  0x13   : > { %p1154_p10 = scmp.lt.s32.totalorder %s1371_s18, 2  ;;  %p1455_p11 = por %p145_p7, %p37_p0 }
  0x14   : > { %p1459_p12 = por %p151_p8, %p43_p3  ;;  %s171_s28 = sand.u32 1, %s1367_s17  }
  0x15   : > { %s1740_s26 = scalar_select %p1455_p11, 1, 0 }
  0x16   : > { %s1741_s27 = scalar_select %p1459_p12, 1, 0 }
  0x17   : > { %s1465_s29 = sshll.u32 %s1371_s18, 9  ;;  %s1469_s30 = sshll.u32 %s171_s28, 5 }
  0x18   : > { %p1471_p13 = pnand %p1154_p10, %p39_p5  ;;  %s192_s6 = sand.u32 1, %s1371_s18  }
  0x19   : > { %s1743_s1 = sld [smem:[#allocation13_spill]]  ;;  %s196_s10 = scalar_lea.vmem [#allocation5], %s1469_s30 }
  0x1a   : > { %s203_s11 = sshll.u32 %s196_s10, 4  ;;  %s1486_s12 = scalar_lea.sflag [#allocation6], %s192_s6  ;;  %s1483_s11 = int_to_ptr.vmem [resolvable:$true] %s203_s11 }
  0x1b   : > { %p1492_p2 = pneg %p1471_p13 }
  0x1f   : > { %s1480_s9 = scalar_lea.hbm %s1743_s1, %s1465_s29  ;;  %s1216_s23 = scalar_lea.hbm %s1743_s1, 1024 }
  0x20   : > { %s1211_s13 = scalar_lea.hbm %s1480_s9, 512  ;;  %p1217_p5 = scmp.lt.u32.totalorder %s1480_s9, %s1743_s1 }
  0x21   : > { %p1212_p1 = scmp.ne.s32.totalorder %s1480_s9, %s1211_s13  ;;  %p1218_p7 = scmp.lt.u32.totalorder %s1216_s23, %s1211_s13 }
  0x22   : > { %p1220_p10 = scmp.lt.u32.totalorder %s1211_s13, %s1480_s9 }
  0x23   : > { %p1214_p3 = pnand %p1492_p2, %p1212_p1  ;;  %p1219_p8 = por %p1218_p7, %p1217_p5 }
  0x25   : > { %p1215_p4 = pneg %p1214_p3  ;;  %p1221_p9 = por %p1220_p10, %p1219_p8 }
  0x27   : > { %p1222_p0 = pnand %p1221_p9, %p1215_p4 }
  0x29   : > { %1225 = shalt.err (!%p1222_p0)
}
  0x2a   : > { %s1226_s6 = scalar_lea.vmem %s1483_s11, 512  ;;  %s1373_s10 = smov [#allocation5]  }
  0x2b   : > { %p1227_p1 = scmp.ne.s32.totalorder %s1483_s11, %s1226_s6  ;;  %s1231_s20 = sshll.u32 %s1373_s10, 4  ;;  %s1232_s20 = int_to_ptr.vmem [resolvable:$false] %s1231_s20 }
  0x2c   : > { %s1233_s22 = scalar_lea.vmem %s1232_s20, 1024  ;;  %p1234_p11 = scmp.lt.s32.totalorder %s1483_s11, %s1232_s20 }
  0x2d   : > { %p1229_p3 = pnand %p1227_p1, %p1492_p2  ;;  %p1235_p6 = scmp.lt.s32.totalorder %s1233_s22, %s1226_s6 }
  0x2f   : > { %p1230_p12 = pneg %p1229_p3  ;;  %p1236_p5 = por %p1235_p6, %p1234_p11 }
  0x31   : > { %p1237_p7 = pnand %p1236_p5, %p1230_p12 }
  0x33   : > { %1240 = shalt.err (!%p1237_p7)
}
  0x34   : > { %s1733_s13 = smov 128   ;;  %s1735_s23 = smov 8  }
  0x35   : > { %1146 = dma.hbm_to_vmem [thread:$0]  (!%p1471_p13), %s1480_s9, 512, %s1483_s11, %s1486_s12, %s1733_s13, %s1733_s13, %s1735_s23  }
  0x36   : > { %p238_p6 = scmp.lt.s32.totalorder %s1371_s18, 3  ;;  %s1745_s0 = sld [smem:[#allocation12_spill]] }
  0x37   : > { %p1746_p9 = scmp.ge.s32.totalorder %s1371_s18, 1  ;;  %s175_s20 = scalar_lea.vmem [#allocation2], %s1469_s30 }
  0x38   : > { %s182_s22 = sshll.u32 %s175_s20, 4  ;;  %s1537_s9 = scalar_lea.sflag [#allocation3], %s171_s28  ;;  %s1533_s22 = int_to_ptr.vmem [resolvable:$true] %s182_s22 }
  0x39   : > { %p1528_p11 = pnand %p1746_p9, %p238_p6 }
  0x3b   : > { %s1747_s10 = scalar_select %p1528_p11, 1, 0 }
  0x3c   : > { %s1524_s6 = scalar_lea.hbm %s1745_s0, %s1465_s29  ;;  %s1246_s13 = scalar_lea.hbm %s1745_s0, 1024 }
  0x3d   : > { %s1241_s11 = scalar_lea.hbm %s1524_s6, 512  ;;  %p1247_p8 = scmp.lt.u32.totalorder %s1524_s6, %s1745_s0 }
  0x3e   : > { %p1242_p12 = scmp.ne.s32.totalorder %s1524_s6, %s1241_s11  ;;  %p1248_p10 = scmp.lt.u32.totalorder %s1246_s13, %s1241_s11 }
  0x3f   : > { %p1250_p3 = scmp.lt.u32.totalorder %s1241_s11, %s1524_s6 }
  0x40   : > { %p1244_p0 = pnand %p1242_p12, %p1492_p2  ;;  %p1249_p1 = por %p1248_p10, %p1247_p8 }
  0x42   : > { %p1245_p4 = pneg %p1244_p0  ;;  %p1251_p5 = por %p1250_p3, %p1249_p1 }
  0x44   : > { %p1252_p7 = pnand %p1251_p5, %p1245_p4 }
  0x46   : > { %1255 = shalt.err (!%p1252_p7)
}
  0x47   : > { %s1256_s28 = scalar_lea.vmem %s1533_s22, 512  ;;  %s1376_s20 = smov [#allocation2]  }
  0x48   : > { %p1257_p6 = scmp.ne.s32.totalorder %s1533_s22, %s1256_s28  ;;  %s1261_s7 = sshll.u32 %s1376_s20, 4  ;;  %s1262_s7 = int_to_ptr.vmem [resolvable:$false] %s1261_s7 }
  0x49   : > { %s1263_s1 = scalar_lea.vmem %s1262_s7, 1024  ;;  %p1264_p0 = scmp.lt.s32.totalorder %s1533_s22, %s1262_s7 }
  0x4a   : > { %p1259_p9 = pnand %p1257_p6, %p1492_p2  ;;  %p1265_p11 = scmp.lt.s32.totalorder %s1263_s1, %s1256_s28 }
  0x4c   : > { %p1260_p12 = pneg %p1259_p9  ;;  %p1266_p8 = por %p1265_p11, %p1264_p0 }
  0x4e   : > { %p1267_p10 = pnand %p1266_p8, %p1260_p12 }
  0x50   : > { %1270 = shalt.err (!%p1267_p10)
}
  0x51   : > { %s1748_s13 = smov 8   ;;  %s1749_s23 = smov 128  }
  0x52   : > { %1143 = dma.hbm_to_vmem [thread:$0]  (!%p1471_p13), %s1524_s6, 512, %s1533_s22, %s1537_s9, %s1749_s23, %s1749_s23, %s1748_s13  }
  0x53   : > { %s1568_s20 = scalar_lea.hbm %s1728_s2, %s1465_s29  ;;  %s217_s28 = scalar_lea.vmem [#allocation7], %s1469_s30 }
  0x54   : > { %s224_s7 = sshll.u32 %s217_s28, 4  ;;  %s1271_s1 = scalar_lea.hbm %s1568_s20, 512  ;;  %s1571_s7 = int_to_ptr.vmem [resolvable:$true] %s224_s7 }
  0x55   : > { %p1272_p11 = scmp.ne.s32.totalorder %s1568_s20, %s1271_s1  ;;  %s1276_s22 = scalar_lea.hbm %s1728_s2, 1024 }
  0x56   : > { %p1277_p3 = scmp.lt.u32.totalorder %s1568_s20, %s1728_s2  ;;  %p1278_p5 = scmp.lt.u32.totalorder %s1276_s22, %s1271_s1 }
  0x57   : > { %p1274_p4 = pnand %p1272_p11, %p1492_p2  ;;  %p1280_p6 = scmp.lt.u32.totalorder %s1271_s1, %s1568_s20 }
  0x58   : > { %p1279_p7 = por %p1278_p5, %p1277_p3 }
  0x59   : > { %p1275_p1 = pneg %p1274_p4 }
  0x5a   : > { %p1281_p9 = por %p1280_p6, %p1279_p7 }
  0x5c   : > { %p1282_p12 = pnand %p1281_p9, %p1275_p1 }
  0x5e   : > { %1285 = shalt.err (!%p1282_p12)
}
  0x5f   : > { %s1286_s30 = scalar_lea.vmem %s1571_s7, 512  ;;  %s1377_s0 = smov [#allocation7]  }
  0x60   : > { %p1287_p0 = scmp.ne.s32.totalorder %s1571_s7, %s1286_s30  ;;  %s1291_s11 = sshll.u32 %s1377_s0, 4  ;;  %s1292_s11 = int_to_ptr.vmem [resolvable:$false] %s1291_s11 }
  0x61   : > { %s1293_s8 = scalar_lea.vmem %s1292_s11, 1024  ;;  %p1294_p11 = scmp.lt.s32.totalorder %s1571_s7, %s1292_s11 }
  0x62   : > { %p1289_p8 = pnand %p1287_p0, %p1492_p2  ;;  %p1295_p4 = scmp.lt.s32.totalorder %s1293_s8, %s1286_s30 }
  0x64   : > { %p1290_p10 = pneg %p1289_p8  ;;  %p1296_p3 = por %p1295_p4, %p1294_p11 }
  0x66   : > { %p1297_p5 = pnand %p1296_p3, %p1290_p10 }
  0x68   : > { %1300 = shalt.err (!%p1297_p5)
}
  0x69   : > { %1149 = dma.hbm_to_vmem [thread:$0]  (!%p1471_p13), %s1568_s20, 512, %s1571_s7, %s1486_s12, %s1749_s23, %s1749_s23, %s1748_s13  }
  0x6a   : > { %p1750_p2 = scmp.ne.s32.totalorder %s1747_s10, 0 }
  0x6b   : > { %s1601_s14 = sand.u32 (!%p1750_p2), 1, %s1363_s16   ;;  %p1751_p1 = scmp.ne.s32.totalorder (!%p1750_p2), %s1739_s25, 0 }
  0x6c   : > { %242 = sbr.rel (%p1750_p2) target bundleno = 1043 (0x413), region = 36  ;;  %s1604_s28 = sshll.u32 (!%p1750_p2), %s1601_s14, 5 }
  0x6d   : > { %s245_s5 = scalar_lea.sflag (!%p1750_p2), [#allocation3], %s1601_s14  ;;  %s248_s1 = scalar_lea.vmem (!%p1750_p2), [#allocation2], %s1604_s28 }
  0x73   : > { %1346 = dma.done.wait (%p1751_p1), %s245_s5, 512  }
  0x74   : > { %1348 = vsyncadd (%p1751_p1), %s245_s5, 4294966784  ;;  %s253_s12 = sand.u32 1, %s1430_s19   ;;  %s257_s13 = scalar_lea.vmem [#allocation5], %s1604_s28 }
  0x75   : > { %s254_s10 = scalar_lea.sflag [#allocation6], %s253_s12 }
  0x76   : > { %1350 = dma.done.wait (%p1751_p1), %s254_s10, 1024  }
  0x77   : > { %1352 = vsyncadd (%p1751_p1), %s254_s10, 4294966272  ;;  %v1378_v0 = vmov 0.0   ;;  %vm1379_vm0 = vmmov 0   ;;  %v312_v1 = vld [vmem:[%s257_s13] sm:$0xff]  ;;  %v313_v2 = vld [vmem:[%s257_s13 + $0x8] sm:$0xff]  ;;  %vm380_vm1 = vcmask 261120   ;;  %v569_v53 = vlaneseq }
  0x78   : > { %1064 = vmatprep.subr.bf16.mxu0 %v1378_v0  ;;  %1070 = vmatprep.subr.bf16.mxu1 %v1378_v0  ;;  %v308_v3 = vld [vmem:[%s248_s1] sm:$0xff]  ;;  %v340_v4 = vmul.f32 8.0, %v312_v1  ;;  %v341_v5 = vmul.f32 8.0, %v313_v2  ;;  %v314_v7 = vld [vmem:[%s257_s13 + $0x10] sm:$0xff]  ;;  %v309_v8 = vld [vmem:[%s248_s1 + $0x8] sm:$0xff]  ;;  %p304_p13 = scmp.lt.s32.totalorder %s1430_s19, 1 }
  0x79   : > { %1066 = vmatprep.mubr.msk.bf16.mxu0 %vm1379_vm0, %v1378_v0  ;;  %1072 = vmatprep.mubr.msk.bf16.mxu1 %vm1379_vm0, %v1378_v0  ;;  %v320_v6 = vmul.f32 8.0, %v308_v3  ;;  %v315_v9 = vld [vmem:[%s257_s13 + $0x18] sm:$0xff]  ;;  %v342_v10 = vmul.f32 8.0, %v314_v7  ;;  %v321_v11 = vmul.f32 8.0, %v309_v8  ;;  %v310_v16 = vld [vmem:[%s248_s1 + $0x10] sm:$0xff]  ;;  %v570_v54 = vshrl.u32 %v569_v53, 7 }
  0x7a   : > { %v343_v12 = vmul.f32 8.0, %v315_v9  ;;  %v1116_v13 = vround.rtne.f32 %v340_v4  ;;  %v1117_v14 = vround.rtne.f32 %v341_v5  ;;  %v311_v17 = vld [vmem:[%s248_s1 + $0x18] sm:$0xff]  ;;  %v322_v25 = vmul.f32 8.0, %v310_v16  ;;  %s305_s25 = scalar_select %p304_p13, %s1430_s19, 1 }
  0x7b   : > { %v1112_v15 = vround.rtne.f32 %v320_v6  ;;  %v1118_v18 = vround.rtne.f32 %v342_v10  ;;  %v1113_v19 = vround.rtne.f32 %v321_v11  ;;  %v323_v26 = vmul.f32 8.0, %v311_v17  ;;  %s266_s6 = scalar_lea.vmem [#allocation7], %s1604_s28  ;;  %s1380_s22 = smov 32  }
  0x7c   : > { %v1119_v20 = vround.rtne.f32 %v343_v12  ;;  %v348_v21 = vmax.f32 %v1116_v13, -128.0  ;;  %v349_v22 = vmax.f32 %v1117_v14, -128.0  ;;  %v1114_v35 = vround.rtne.f32 %v322_v25  ;;  %s306_s7 = scalar_lea.vmem %s1729_s3, %s305_s25  ;;  %s1381_s9 = smov 64  }
  0x7d   : > { %v350_v23 = vmax.f32 %v1118_v18, -128.0  ;;  %v328_v29 = vmax.f32 %v1112_v15, -128.0  ;;  %v329_v30 = vmax.f32 %v1113_v19, -128.0  ;;  %v1115_v36 = vround.rtne.f32 %v323_v26  ;;  %v1036_v58 = vld [vmem:[%s306_s7] ss:$0 sm:$0xff]  ;;  %s1382_s29 = smov 96  }
  0x7e   : > { %v351_v24 = vmax.f32 %v1119_v20, -128.0  ;;  %v352_v27 = vmin.f32 %v348_v21, 127.0  ;;  %v353_v28 = vmin.f32 %v349_v22, 127.0  ;;  %v330_v45 = vmax.f32 %v1114_v35, -128.0  ;;  %s1031_s30 = sshll.u32 %s1601_s14, 3  ;;  %s1042_s0 = sshll.u32 %s1430_s19, 7 }
  0x7f   : > { %v354_v33 = vmin.f32 %v350_v23, 127.0  ;;  %v332_v39 = vmin.f32 %v328_v29, 127.0  ;;  %v333_v40 = vmin.f32 %v329_v30, 127.0  ;;  %v331_v46 = vmax.f32 %v1115_v36, -128.0  ;;  %s303_s11 = scalar_lea.vmem [#allocation8], %s1031_s30  ;;  %s1682_s1 = scalar_lea.hbm %s1730_s4, %s1042_s0 }
  0x80   : > { %v356_v31 = vpack.c.bf16 %v352_v27, %v352_v27  ;;  %v357_v32 = vpack.c.bf16 %v353_v28, %v353_v28  ;;  %v355_v34 = vmin.f32 %v351_v24, 127.0  ;;  %v334_v49 = vmin.f32 %v330_v45, 127.0  ;;  %s893_s8 = sshll.u32 %s303_s11, 4  ;;  %s880_s19 = scalar_lea.sflag [#allocation4], %s1601_s14  ;;  %s1684_s8 = int_to_ptr.vmem [resolvable:$true] %s893_s8 }
  0x81   : > { %v358_v41 = vpack.c.bf16 %v354_v33, %v354_v33  ;;  %v336_v43 = vpack.c.bf16 %v332_v39, %v332_v39  ;;  %v337_v44 = vpack.c.bf16 %v333_v40, %v333_v40  ;;  %v335_v50 = vmin.f32 %v331_v46, 127.0  ;;  %v316_v46 = vld [vmem:[%s266_s6] sm:$0xff]  ;;  %s1301_s12 = scalar_lea.vmem %s1684_s8, 128  ;;  %p1752_p6 = scmp.ne.s32.totalorder %s1740_s26, 0 }
  0x82   : > { %v385_v37 = vsel %vm380_vm1, %v356_v31, 0  ;;  %v431_v38 = vsel %vm380_vm1, %v357_v32, 0  ;;  %v359_v42 = vpack.c.bf16 %v355_v34, %v355_v34  ;;  %v338_v51 = vpack.c.bf16 %v334_v49, %v334_v49  ;;  %v317_v49 = vld [vmem:[%s266_s6 + $0x8] sm:$0xff]  ;;  %p1302_p7 = scmp.ne.s32.totalorder %s1684_s8, %s1301_s12  ;;  %s1383_s10 = smov [#allocation8]  }
  0x83   : > { %1065 = vmatpush3.bf16.xpose.msra.mxu0 %v385_v37  ;;  %1071 = vmatpush3.bf16.xpose.msra.mxu1 %v431_v38  ;;  %v477_v47 = vsel %vm380_vm1, %v358_v41, 0  ;;  %v339_v52 = vpack.c.bf16 %v335_v50, %v335_v50  ;;  %v572_v55 = vand.u32 127, %v569_v53  ;;  %vm591_vm3 = vcmask 64512   ;;  %s1305_s13 = sshll.u32 %s1383_s10, 4  ;;  %s1306_s13 = int_to_ptr.vmem [resolvable:$false] %s1305_s13 }
  0x84   : > { %1076 = vmatprep.subr.bf16.mxu0 %v1378_v0  ;;  %1082 = vmatprep.subr.bf16.mxu1 %v1378_v0  ;;  %v523_v48 = vsel %vm380_vm1, %v359_v42, 0  ;;  %vm659_vm4 = vcmask 1043456   ;;  %vm874_vm5 = vcmask 523264   ;;  %vm876_vm6 = vcmask 785408   ;;  %p1303_p9 = pnand %p1302_p7, %p1752_p6  ;;  %s1307_s25 = scalar_lea.vmem %s1306_s13, 256 }
  0x85   : > { %vm573_vm2 = vcmp.le.s32.totalorder %v572_v55, %v570_v54  ;;  %v318_v54 = vld [vmem:[%s266_s6 + $0x10] sm:$0xff]  ;;  %p1308_p0 = scmp.lt.s32.totalorder %s1684_s8, %s1306_s13  ;;  %p1309_p8 = scmp.lt.s32.totalorder %s1307_s25, %s1301_s12 }
  0x86   : > { %p1304_p12 = pneg %p1303_p9 }
  0x87   : > { %p1310_p10 = por %p1309_p8, %p1308_p0 }
  0x89   : > { %p1311_p11 = pnand %p1310_p10, %p1304_p12 }
  0x8a   : > { %1067 = vmatmul.mubr.msk.bf16.vlgmr.msra.gmra.mrb[0].mxu0 %vm380_vm1, %v336_v43  ;;  %1073 = vmatmul.mubr.msk.bf16.vlgmr.msra.gmra.mrb[0].mxu1 %vm380_vm1, %v337_v44 }
  0x8b   : > { %1077 = vmatpush3.bf16.xpose.msra.mxu0 %v477_v47  ;;  %1083 = vmatpush3.bf16.xpose.msra.mxu1 %v523_v48  ;;  %v360_v47 = vmul.f32 8.0, %v316_v46 }
  0x8c   : > { %1078 = vmatprep.mubr.msk.bf16.mxu0 %vm1379_vm0, %v1378_v0  ;;  %1084 = vmatprep.mubr.msk.bf16.mxu1 %vm1379_vm0, %v1378_v0 }
  0x8d   : > { %1088 = vmatprep.subr.bf16.mxu0 %v1378_v0  ;;  %1094 = vmatprep.subr.bf16.mxu1 %v1378_v0  ;;  %v1120_v48 = vround.rtne.f32 %v360_v47 }
  0x8f   : > { %v368_v50 = vmax.f32 %v1120_v48, -128.0 }
  0x92   : > { %1079 = vmatmul.mubr.msk.bf16.vlgmr.msra.gmra.mrb[4].mxu0 %vm380_vm1, %v338_v51  ;;  %1085 = vmatmul.mubr.msk.bf16.vlgmr.msra.gmra.mrb[4].mxu1 %vm380_vm1, %v339_v52  ;;  %v361_v51 = vmul.f32 8.0, %v317_v49  ;;  %v372_v52 = vmin.f32 %v368_v50, 127.0 }
  0x93   : > { %1090 = vmatprep.mubr.msk.bf16.mxu0 %vm1379_vm0, %v1378_v0  ;;  %1096 = vmatprep.mubr.msk.bf16.mxu1 %vm1379_vm0, %v1378_v0 }
  0x94   : > { %v1121_v53 = vround.rtne.f32 %v361_v51  ;;  %v376_v55 = vpack.c.bf16 %v372_v52, %v372_v52 }
 0x15d   : > { %v421_v56 = vpop.f32.mrb[0].mxu0  ;;  %v467_v57 = vpop.f32.mrb[0].mxu1 }
 0x15e   : > { %v565_v59 = vmul.f32 0.0027621358, %v421_v56  ;;  %v1068_v60 = vpop.f32.mrb[1].mxu0  ;;  %v566_v61 = vmul.f32 0.0027621358, %v467_v57  ;;  %v1074_v62 = vpop.f32.mrb[1].mxu1 }
 0x15f   : > { %v424_v63 = vpop.f32.mrb[2].mxu0  ;;  %v470_v1 = vpop.f32.mrb[2].mxu1  ;;  %v369_v56 = vmax.f32 %v1121_v53, -128.0  ;;  %v362_v57 = vmul.f32 8.0, %v318_v54 }
 0x160   : > { %v576_v2 = vsel %vm573_vm2, %v565_v59, -3.4028235e+38  ;;  %v577_v3 = vsel %vm573_vm2, %v566_v61, -3.4028235e+38  ;;  %v1069_v4 = vpop.f32.mrb[3].mxu0  ;;  %v1075_v5 = vpop.f32.mrb[3].mxu1 }
 0x161   : > { %v587_v6 = vadd.f32 %v1036_v58, %v576_v2  ;;  %v588_v7 = vadd.f32 %v1036_v58, %v577_v3  ;;  %v373_v59 = vmin.f32 %v369_v56, 127.0  ;;  %v1122_v60 = vround.rtne.f32 %v362_v57  ;;  %v319_v61 = vld [vmem:[%s266_s6 + $0x18] sm:$0xff] }
 0x162   : > { %v363_v1 = vmul.f32 8.0, %v319_v61 }
 0x163   : > { %v592_v8 = vsel %vm591_vm3, %v587_v6, -inf  ;;  %v595_v11 = vsel %vm591_vm3, %v588_v7, -inf  ;;  %v377_v62 = vpack.c.bf16 %v373_v59, %v373_v59  ;;  %v370_v63 = vmax.f32 %v1122_v60, -128.0 }
 0x164   : > { %593 = vmax.xlane.f32.xlu0 %v592_v8  ;;  %v1123_v4 = vround.rtne.f32 %v363_v1 }
 0x165   : > { %v513_v9 = vpop.f32.mrb[4].mxu0  ;;  %v559_v10 = vpop.f32.mrb[4].mxu1  ;;  %v707_v2 = vsel %vm659_vm4, %v377_v62, 0  ;;  %v374_v3 = vmin.f32 %v370_v63, 127.0 }
 0x166   : > { %v567_v12 = vmul.f32 0.0027621358, %v513_v9  ;;  %v1080_v13 = vpop.f32.mrb[5].mxu0  ;;  %v568_v14 = vmul.f32 0.0027621358, %v559_v10  ;;  %v1086_v15 = vpop.f32.mrb[5].mxu1  ;;  %1095 = vmatpush3.bf16.msra.mxu1 %v707_v2 }
 0x167   : > { %v516_v16 = vpop.f32.mrb[6].mxu0  ;;  %v562_v17 = vpop.f32.mrb[6].mxu1  ;;  %v378_v5 = vpack.c.bf16 %v374_v3, %v374_v3  ;;  %1106 = vmatprep.subr.bf16.mxu1 %v1378_v0 }
 0x168   : > { %v578_v18 = vsel %vm573_vm2, %v567_v12, -3.4028235e+38  ;;  %v579_v19 = vsel %vm573_vm2, %v568_v14, -3.4028235e+38  ;;  %596 = vmax.xlane.f32.xlu0 %v595_v11  ;;  %v1081_v20 = vpop.f32.mrb[7].mxu0  ;;  %v1087_v21 = vpop.f32.mrb[7].mxu1 }
 0x169   : > { %v589_v22 = vadd.f32 %v1036_v58, %v578_v18  ;;  %v590_v23 = vadd.f32 %v1036_v58, %v579_v19  ;;  %v661_v58 = vsel %vm659_vm4, %v376_v55, 0 }
 0x16a   : > { %1089 = vmatpush3.bf16.msra.mxu0 %v661_v58 }
 0x16b   : > { %v598_v24 = vsel %vm591_vm3, %v589_v22, -inf  ;;  %v601_v25 = vsel %vm591_vm3, %v590_v23, -inf  ;;  %1100 = vmatprep.subr.bf16.mxu0 %v1378_v0 }
 0x16c   : > { %599 = vmax.xlane.f32.xlu1 %v598_v24 }
 0x170   : > { %602 = vmax.xlane.f32.xlu1 %v601_v25 }
 0x1f1   : > { %v594_v26 = vpop.xlane.xlu0 %593 }
 0x1f2   : > { %v604_v27 = vsub.f32 %v587_v6, %v594_v26  ;;  %v371_v6 = vmax.f32 %v1123_v4, -128.0 }
 0x1f4   : > { %v608_v28 = vmul.f32 1.442695, %v604_v27  ;;  %v375_v8 = vmin.f32 %v371_v6, 127.0 }
 0x1f5   : > { %v597_v29 = vpop.xlane.xlu0 %596 }
 0x1f6   : > { %1195 = vpow2.f32 %v608_v28  ;;  %v605_v30 = vsub.f32 %v588_v7, %v597_v29  ;;  %v753_v7 = vsel %vm659_vm4, %v378_v5, 0  ;;  %v379_v9 = vpack.c.bf16 %v375_v8, %v375_v8 }
 0x1f8   : > { %v610_v31 = vmul.f32 1.442695, %v605_v30  ;;  %v799_v10 = vsel %vm659_vm4, %v379_v9, 0 }
 0x1f9   : > { %v600_v32 = vpop.xlane.xlu1 %599 }
 0x1fa   : > { %1197 = vpow2.f32 %v610_v31  ;;  %v606_v33 = vsub.f32 %v589_v22, %v600_v32 }
 0x1fc   : > { %v612_v34 = vmul.f32 1.442695, %v606_v33 }
 0x1fd   : > { %v603_v35 = vpop.xlane.xlu1 %602 }
 0x1fe   : > { %1199 = vpow2.f32 %v612_v34  ;;  %v607_v36 = vsub.f32 %v590_v23, %v603_v35 }
 0x200   : > { %v1196_v37 = vpop.eup %1195  ;;  %v614_v38 = vmul.f32 1.442695, %v607_v36 }
 0x201   : > { %v616_v39 = vsel %vm591_vm3, %v1196_v37, 0.0 }
 0x202   : > { %1201 = vpow2.f32 %v614_v38  ;;  %617 = vadd.xlane.f32.xlu0 %v616_v39 }
 0x204   : > { %v1198_v40 = vpop.eup %1197 }
 0x205   : > { %v619_v41 = vsel %vm591_vm3, %v1198_v40, 0.0 }
 0x206   : > { %620 = vadd.xlane.f32.xlu1 %v619_v41 }
 0x208   : > { %v1200_v42 = vpop.eup %1199 }
 0x209   : > { %v622_v43 = vsel %vm591_vm3, %v1200_v42, 0.0 }
 0x20a   : > { %623 = vadd.xlane.f32.xlu0 %v622_v43 }
 0x20c   : > { %v1202_v44 = vpop.eup %1201 }
 0x20d   : > { %v625_v45 = vsel %vm591_vm3, %v1202_v44, 0.0 }
 0x20e   : > { %626 = vadd.xlane.f32.xlu1 %v625_v45 }
 0x28f   : > { %v618_v11 = vpop.xlane.xlu0 %617 }
 0x290   : > { %1203 = vrcp.f32 %v618_v11 }
 0x293   : > { %v621_v12 = vpop.xlane.xlu1 %620 }
 0x294   : > { %1205 = vrcp.f32 %v621_v12 }
 0x297   : > { %v624_v13 = vpop.xlane.xlu0 %623 }
 0x298   : > { %1207 = vrcp.f32 %v624_v13 }
 0x29a   : > { %v1204_v14 = vpop.eup %1203 }
 0x29b   : > { %v632_v15 = vmul.f32 %v1204_v14, %v1196_v37  ;;  %v627_v16 = vpop.xlane.xlu1 %626 }
 0x29c   : > { %1209 = vrcp.f32 %v627_v16 }
 0x29d   : > { %v636_v17 = vmul.f32 127.0, %v632_v15 }
 0x29e   : > { %v1206_v18 = vpop.eup %1205 }
 0x29f   : > { %v1124_v19 = vround.rtne.f32 %v636_v17  ;;  %v633_v20 = vmul.f32 %v1206_v18, %v1198_v40 }
 0x2a1   : > { %v637_v21 = vmul.f32 127.0, %v633_v20  ;;  %v644_v22 = vmax.f32 %v1124_v19, 0.0 }
 0x2a2   : > { %v1208_v23 = vpop.eup %1207 }
 0x2a3   : > { %v1125_v24 = vround.rtne.f32 %v637_v21  ;;  %v634_v25 = vmul.f32 %v1208_v23, %v1200_v42  ;;  %v648_v26 = vmin.f32 %v644_v22, 255.0 }
 0x2a5   : > { %v638_v27 = vmul.f32 127.0, %v634_v25  ;;  %v652_v28 = vpack.c.bf16 %v648_v26, %v648_v26  ;;  %v645_v29 = vmax.f32 %v1125_v24, 0.0 }
 0x2a6   : > { %v1210_v30 = vpop.eup %1209 }
 0x2a7   : > { %v1126_v31 = vround.rtne.f32 %v638_v27  ;;  %v635_v32 = vmul.f32 %v1210_v30, %v1202_v44  ;;  %1091 = vmatmul.mubr.msk.bf16.vlgmr.msra.gmra.mrb[8].mxu0 %vm591_vm3, %v652_v28  ;;  %v649_v33 = vmin.f32 %v645_v29, 255.0 }
 0x2a8   : > { %1101 = vmatpush3.bf16.msra.mxu0 %v753_v7  ;;  %1102 = vmatprep.mubr.msk.bf16.mxu0 %vm1379_vm0, %v1378_v0 }
 0x2a9   : > { %v639_v34 = vmul.f32 127.0, %v635_v32  ;;  %v653_v35 = vpack.c.bf16 %v649_v33, %v649_v33  ;;  %v646_v36 = vmax.f32 %v1126_v31, 0.0 }
 0x2ab   : > { %v1127_v37 = vround.rtne.f32 %v639_v34  ;;  %1097 = vmatmul.mubr.msk.bf16.vlgmr.msra.gmra.mrb[8].mxu1 %vm591_vm3, %v653_v35  ;;  %v650_v38 = vmin.f32 %v646_v36, 255.0 }
 0x2ac   : > { %1107 = vmatpush3.bf16.msra.mxu1 %v799_v10  ;;  %1108 = vmatprep.mubr.msk.bf16.mxu1 %vm1379_vm0, %v1378_v0 }
 0x2ad   : > { %v654_v39 = vpack.c.bf16 %v650_v38, %v650_v38  ;;  %v647_v40 = vmax.f32 %v1127_v37, 0.0 }
 0x2af   : > { %1103 = vmatmul.mubr.msk.bf16.vlgmr.msra.gmra.mrb[12].mxu0 %vm591_vm3, %v654_v39  ;;  %v651_v41 = vmin.f32 %v647_v40, 255.0 }
 0x2b1   : > { %v655_v42 = vpack.c.bf16 %v651_v41, %v651_v41 }
 0x2b3   : > { %1109 = vmatmul.mubr.msk.bf16.vlgmr.msra.gmra.mrb[12].mxu1 %vm591_vm3, %v655_v42 }
 0x37a   : > { %v697_v43 = vpop.f32.mrb[8].mxu0 }
 0x37b   : > { %v1092_v44 = vpop.f32.mrb[9].mxu0  ;;  %v841_v10 = vmul.f32 0.000984252, %v697_v43 }
 0x37c   : > { %v700_v45 = vpop.f32.mrb[10].mxu0 }
 0x37d   : > { %v1093_v46 = vpop.f32.mrb[11].mxu0  ;;  %v845_v11 = vmul.f32 0.5, %v841_v10 }
 0x37e   : > { %v743_v47 = vpop.f32.mrb[8].mxu1 }
 0x37f   : > { %v842_v48 = vmul.f32 0.000984252, %v743_v47  ;;  %v1098_v49 = vpop.f32.mrb[9].mxu1  ;;  %v1128_v12 = vround.rtne.f32 %v845_v11 }
 0x380   : > { %v746_v50 = vpop.f32.mrb[10].mxu1 }
 0x381   : > { %v846_v51 = vmul.f32 0.5, %v842_v48  ;;  %v1099_v52 = vpop.f32.mrb[11].mxu1  ;;  %v853_v13 = vmax.f32 %v1128_v12, -128.0 }
 0x382   : > { %v789_v53 = vpop.f32.mrb[12].mxu0 }
 0x383   : > { %v1129_v0 = vround.rtne.f32 %v846_v51  ;;  %v843_v54 = vmul.f32 0.000984252, %v789_v53  ;;  %v1104_v55 = vpop.f32.mrb[13].mxu0  ;;  %v857_v16 = vmin.f32 %v853_v13, 127.0 }
 0x384   : > { %v792_v56 = vpop.f32.mrb[14].mxu0 }
 0x385   : > { %v854_v57 = vmax.f32 %v1129_v0, -128.0  ;;  %v847_v58 = vmul.f32 0.5, %v843_v54  ;;  %v1105_v59 = vpop.f32.mrb[15].mxu0 }
 0x386   : > { %v835_v60 = vpop.f32.mrb[12].mxu1 }
 0x387   : > { %v858_v61 = vmin.f32 %v854_v57, 127.0  ;;  %v1130_v62 = vround.rtne.f32 %v847_v58  ;;  %v844_v63 = vmul.f32 0.000984252, %v835_v60  ;;  %v1110_v1 = vpop.f32.mrb[13].mxu1 }
 0x388   : > { %v838_v2 = vpop.f32.mrb[14].mxu1 }
 0x389   : > { %v855_v3 = vmax.f32 %v1130_v62, -128.0  ;;  %v848_v4 = vmul.f32 0.5, %v844_v63  ;;  %862 = vrot.lane.b32.xlu0 %v858_v61, %s1380_s22  ;;  %v1111_v5 = vpop.f32.mrb[15].mxu1 }
 0x38b   : > { %v859_v6 = vmin.f32 %v855_v3, 127.0  ;;  %v1131_v7 = vround.rtne.f32 %v848_v4 }
 0x38d   : > { %v856_v8 = vmax.f32 %v1131_v7, -128.0  ;;  %866 = vrot.lane.b32.xlu1 %v859_v6, %s1381_s9 }
 0x38f   : > { %v860_v9 = vmin.f32 %v856_v8, 127.0 }
 0x391   : > { %870 = vrot.lane.b32.xlu1 %v860_v9, %s1382_s29 }
 0x3fb   : > { %v863_v14 = vpop.permute.xlu0 %862 }
 0x3fc   : > { %v873_v17 = vsel %vm380_vm1, %v857_v16, %v863_v14 }
 0x3ff   : > { %v867_v15 = vpop.permute.xlu1 %866 }
 0x400   : > { %v875_v18 = vsel %vm874_vm5, %v873_v17, %v867_v15 }
 0x403   : > { %v871_v19 = vpop.permute.xlu1 %870 }
 0x404   : > { %v877_v20 = vsel %vm876_vm6, %v875_v18, %v871_v19 }
 0x405   : > { %878 = vst [vmem:[%s303_s11] sm:$0xff] %v877_v20 }
 0x406   : > { %1314 = shalt.err (!%p1311_p11)
}
 0x407   : > { %s1315_s14 = scalar_lea.hbm %s1682_s1, 128  ;;  %s1319_s7 = scalar_lea.hbm %s1730_s4, 256 }
 0x408   : > { %p1316_p4 = scmp.ne.s32.totalorder %s1682_s1, %s1315_s14  ;;  %p1320_p2 = scmp.lt.u32.totalorder %s1682_s1, %s1730_s4 }
 0x409   : > { %p1321_p1 = scmp.lt.u32.totalorder %s1319_s7, %s1315_s14  ;;  %p1323_p7 = scmp.lt.u32.totalorder %s1315_s14, %s1682_s1 }
 0x40a   : > { %p1317_p3 = pnand %p1316_p4, %p1752_p6 }
 0x40b   : > { %p1322_p13 = por %p1321_p1, %p1320_p2 }
 0x40c   : > { %p1318_p5 = pneg %p1317_p3 }
 0x40d   : > { %p1324_p9 = por %p1323_p7, %p1322_p13 }
 0x40f   : > { %p1325_p12 = pnand %p1324_p9, %p1318_p5 }
 0x411   : > { %1328 = shalt.err (!%p1325_p12)
}
 0x412   : > { %1138 = dma.vmem_to_hbm [thread:$0]  (%p1752_p6), %s1684_s8, 128, %s1682_s1, %s880_s19  }
 0x413 PF: > { %s905_s9 = sand.u32 1, %s1359_s15   ;;  %p1753_p0 = scmp.ne.s32.totalorder %s1741_s27, 0 }
 0x414   : > { %p1754_p8 = scmp.ge.s32.totalorder %s1371_s18, 2  ;;  %s906_s29 = scalar_lea.sflag [#allocation4], %s905_s9 }
 0x416   : > { %p1151_p10 = pnand %p1754_p8, %p1753_p0 }
 0x418   : > { %1354 = dma.done.wait (!%p1151_p10), %s906_s29, 128  }
 0x419   : > { %1356 = vsyncadd (!%p1151_p10), %s906_s29, 4294967168  ;;  %p20_p11 = scmp.ge.s32.totalorder %s1434_s21, 4   ;;  %s1755_s15 = smov %s1363_s16 }
 0x41a   : > { %s1756_s16 = smov %s1367_s17  ;;  %s1757_s17 = smov %s1446_s24 }
 0x41b   : > { %s1758_s18 = smov %s1434_s21  ;;  %22 = sbr.rel (!%p20_p11) target bundleno = 10 (0xa), region = 108 }
 0x422   :  { %911 = vsyncpa [#allocation3], 1 }
 0x423   :  { %913 = vsyncpa [#allocation3 + $0x1], 1 }
 0x424   :  { %914 = vsyncpa [#allocation6], 1 }
 0x425   :  { %916 = vsyncpa [#allocation6 + $0x1], 1 }
 0x426   :  { %917 = vsyncpa [#allocation4], 1 }
 0x427   :  { %919 = vsyncpa [#allocation4 + $0x1], 1 }

</bundles_post_ra>
